<compile_context>
chip_gen: v7x
topology: tpu7x:2x2x1
jax: 0.10.0
libtpu: 0.0.40
codegen_flags: <defaults>
</compile_context>

<pallas_src>
import functools

import jax
import jax.numpy as jnp
from jax.experimental import pallas as pl
from jax.experimental.pallas import tpu as pltpu


def _round_up(x, m):
    return ((x + m - 1) // m) * m


def _round_down(x, m):
    return (x // m) * m


def _cdiv(a, b):
    return -(-a // b)


def _vmem_budget_bytes():
    """Conservative VMEM budget (leaves headroom below physical capacity)."""
    try:
        phys = pltpu.get_tpu_info().vmem_capacity_bytes
    except Exception:
        phys = 64 * 1024 * 1024  # v7x per-TensorCore VMEM: most restrictive gen
    return int(phys * 0.75)


def _activation_net_kernel(*refs, apply_mask):
    if apply_mask:
        (x_ref, w1_ref, b1_ref, w2_ref, b2_ref, w3_ref, b3_ref,
         mask_ref, o_ref) = refs
    else:
        (x_ref, w1_ref, b1_ref, w2_ref, b2_ref, w3_ref, b3_ref, o_ref) = refs
        mask_ref = None

    # x_ref:    (tm, dim)     f32 (HBM dtype) -- cast to MXU dtype in VMEM, so
    #                         the wrapper never does an extra HBM cast pass.
    # w1_ref:   (dim, 2*dim)  matmul dtype (resident, single-buffered)
    # b1_ref:   (1, 2*dim)    f32
    # w2_ref:   (2*dim, dim)  matmul dtype
    # b2_ref:   (1, dim)      f32
    # w3_ref:   (8, dim)      f32, 8 identical replicated rows (row 0 used)
    # b3_ref:   (1, 1)        f32
    # mask_ref: (1, tm)       f32 (optional)
    # o_ref:    (1, tm)       f32, lane-dense output
    x = x_ref[...].astype(w1_ref.dtype)

    h1 = jnp.dot(x, w1_ref[...], preferred_element_type=jnp.float32)
    h1 = jnp.maximum(h1 + b1_ref[...], 0.0)

    h2 = jnp.dot(h1.astype(w2_ref.dtype), w2_ref[...],
                 preferred_element_type=jnp.float32)
    h2 = jnp.maximum(h2 + b2_ref[...], 0.0)

    # Final dim -> 1 projection, computed directly in the lane-dense layout:
    #   z8[r, t] = sum_d w3[r, d] * h2[t, d]     -> (8, tm), rows identical.
    # Transposed-RHS contraction = native MXU path (same as q @ k^T), no XLU
    # transpose of the (tm, dim) tile and no (tm,1)->(1,tm) relayout.
    z8 = jax.lax.dot_general(
        w3_ref[...], h2,
        dimension_numbers=(((1,), (1,)), ((), ())),
        preferred_element_type=jnp.float32)
    z = z8[0:1, :] + b3_ref[...]                     # (1, tm)

    out = jax.nn.sigmoid(z)                          # (1, tm)
    if mask_ref is not None:
        out = out * mask_ref[...]
    o_ref[...] = out.astype(o_ref.dtype)


def activation_network(x, params, mask=None, *, row_tile=None,
                       matmul_dtype=jnp.bfloat16):
    """Pallas implementation of ActivationNetwork.forward.

    x:    (..., dim), mask: optional, broadcastable to x.shape[:-1].
    Returns array of shape x.shape[:-1].
    matmul_dtype=bfloat16 trades ~1e-2 accuracy in z for MXU throughput; use
    jnp.float32 for reference-accurate results.
    """
    w1, b1, w2, b2, w3, b3 = params
    original_shape = x.shape
    dim = original_shape[-1]
    x2d = x.reshape(-1, dim)
    n = x2d.shape[0]

    itemsize = jnp.dtype(matmul_dtype).itemsize
    budget = _vmem_budget_bytes()

    # VMEM live set per tile row:
    #   x f32 double-buffered (8*dim) + h1 f32 (8*dim) + h2 f32 (4*dim)
    #   + out/mask f32 double-buffered (16 B).
    per_row = 20 * dim + 16
    # Resident weights (single-buffered): W1, W2 in matmul dtype + w3_8 + biases.
    weight_bytes = 4 * dim * dim * itemsize + 8 * dim * 4 + (3 * dim + 2) * 4
    # TODO(synk): for dim >~ 1k, additionally chunk the hidden (2*dim) axis with
    # an in-kernel fori_loop so h1 never holds the full (tm, 2*dim) f32 slab.
    avail = max(budget - weight_bytes - (2 << 20), per_row * 128)
    tm_cap = max(128, _round_down(avail // per_row, 128))

    if row_tile is not None:
        tm = _round_up(int(row_tile), 128)
    else:
        # Target ~2 MiB of f32 x per tile to amortize the ~0.35us grid-step cost.
        tm = (2 * 1024 * 1024) // (dim * 4)
        tm = _round_up(max(256, min(tm, 8192)), 128)
    tm = min(tm, tm_cap)

    # v7x has 2 TensorCores: ensure the "parallel" grid axis has >= 2 tiles
    # whenever there is enough work to split (harmless on 1-TC chips).
    if n >= 1024:
        tm = min(tm, _round_up(_cdiv(n, 2), 128))

    if tm >= n:
        tm = n            # single full-extent block (tiny / ragged n, no padding)
        num_tiles = 1
    else:
        num_tiles = _cdiv(n, tm)   # last block partial; garbage lanes never stored

    # Weights / biases (small, cast once in the wrapper).
    w1c = w1.astype(matmul_dtype)
    w2c = w2.astype(matmul_dtype)
    b1_2d = b1.reshape(1, 2 * dim).astype(jnp.float32)
    b2_2d = b2.reshape(1, dim).astype(jnp.float32)
    # 8 identical sublane replicas of w3 -> MXU-friendly LHS for the final dot.
    w3_8 = jnp.broadcast_to(w3.reshape(1, dim).astype(jnp.float32), (8, dim))
    b3_2d = b3.reshape(1, 1).astype(jnp.float32)

    apply_mask = mask is not None
    operands = [x2d, w1c, b1_2d, w2c, b2_2d, w3_8, b3_2d]
    if apply_mask:
        mask2d = jnp.broadcast_to(mask, original_shape[:-1]).astype(
            jnp.float32).reshape(1, n)
        operands.append(mask2d)

    kernel = functools.partial(_activation_net_kernel, apply_mask=apply_mask)

    # vmem limit sized from the live set (weights kept at 2x as safety margin).
    est = 2 * weight_bytes + per_row * tm + (4 << 20)
    vmem_limit = int(min(max(est, 32 * 1024 * 1024), budget))

    def _run(single_buffer_weights):
        def resident(block_shape):
            index_map = lambda i: (0,) * len(block_shape)
            if single_buffer_weights:
                return pl.BlockSpec(block_shape, index_map,
                                    pipeline_mode=pl.Buffered(1))
            return pl.BlockSpec(block_shape, index_map)

        in_specs = [
            pl.BlockSpec((tm, dim), lambda i: (i, 0)),     # x tile (streamed)
            resident((dim, 2 * dim)),                      # W1 (resident)
            resident((1, 2 * dim)),                        # b1
            resident((2 * dim, dim)),                      # W2 (resident)
            resident((1, dim)),                            # b2
            resident((8, dim)),                            # W3 replicated rows
            resident((1, 1)),                              # b3
        ]
        if apply_mask:
            in_specs.append(pl.BlockSpec((1, tm), lambda i: (0, i)))

        return pl.pallas_call(
            kernel,
            out_shape=jax.ShapeDtypeStruct((1, n), jnp.float32),
            grid_spec=pltpu.PrefetchScalarGridSpec(
                num_scalar_prefetch=0,
                grid=(num_tiles,),
                in_specs=in_specs,
                out_specs=pl.BlockSpec((1, tm), lambda i: (0, i)),
            ),
            compiler_params=pltpu.CompilerParams(
                dimension_semantics=("parallel",),
                vmem_limit_bytes=vmem_limit),
        )(*operands)

    try:
        out2d = _run(single_buffer_weights=True)
    except Exception:
        # pl.Buffered(1) not supported on this jax version -> default buffering.
        out2d = _run(single_buffer_weights=False)

    # (1, n) lane-dense output -> original leading shape (== reshape + squeeze).
    return out2d.reshape(original_shape[:-1])


def init_params(key, dim):
    """Deterministic init matching the nn.Linear shapes (stored as (in, out))."""
    k1, k2, k3, k4, k5, k6 = jax.random.split(key, 6)
    s1 = 1.0 / jnp.sqrt(dim)
    s2 = 1.0 / jnp.sqrt(2 * dim)
    w1 = jax.random.uniform(k1, (dim, 2 * dim), jnp.float32, -s1, s1)
    b1 = jax.random.uniform(k2, (2 * dim,), jnp.float32, -s1, s1)
    w2 = jax.random.uniform(k3, (2 * dim, dim), jnp.float32, -s2, s2)
    b2 = jax.random.uniform(k4, (dim,), jnp.float32, -s2, s2)
    w3 = jax.random.uniform(k5, (dim, 1), jnp.float32, -s1, s1)
    b3 = jax.random.uniform(k6, (1,), jnp.float32, -s1, s1)
    return (w1, b1, w2, b2, w3, b3)


def reference(x, params, mask=None):
    w1, b1, w2, b2, w3, b3 = params
    shape = x.shape
    x2d = x.reshape(-1, shape[-1])
    h1 = jnp.maximum(x2d @ w1 + b1, 0.0)
    h2 = jnp.maximum(h1 @ w2 + b2, 0.0)
    z = h2 @ w3 + b3
    out = jax.nn.sigmoid(z).reshape(shape[:-1] + (1,)).squeeze(-1)
    if mask is not None:
        out = out * mask
    return out


if __name__ == "__main__":
    key = jax.random.PRNGKey(0)
    kx, kp, km, kx2 = jax.random.split(key, 4)

    batch, seq, dim = 2, 8, 32
    x = jax.random.normal(kx, (batch, seq, dim), dtype=jnp.float32)
    mask = (jax.random.uniform(km, (batch, seq)) > 0.3).astype(jnp.float32)
    params = init_params(kp, dim)

    # 1) f32 MXU path with mask applied in-kernel, single full-extent tile.
    out = activation_network(x, params, mask=mask, matmul_dtype=jnp.float32)
    out = jax.block_until_ready(out)
    ref = reference(x, params, mask=mask)
    assert out.shape == (batch, seq), out.shape
    assert jnp.allclose(out, ref, atol=2e-3, rtol=2e-3), float(
        jnp.max(jnp.abs(out - ref)))

    # 2) Default fast path: bf16 MXU dtype, no mask, ragged N with a forced
    #    small row tile so the multi-tile / partial-last-block path is exercised.
    x2 = jax.random.normal(kx2, (3, 70, dim), dtype=jnp.float32)
    out2 = activation_network(x2, params, mask=None, row_tile=128)
    out2 = jax.block_until_ready(out2)
    ref2 = reference(x2, params, mask=None)
    assert out2.shape == (3, 70), out2.shape
    assert jnp.allclose(out2, ref2, atol=2e-2, rtol=2e-2), float(
        jnp.max(jnp.abs(out2 - ref2)))

    print("KERNEL_OK")
</pallas_src>

<mosaic_0001>
module attributes {stable_mosaic.version = 11 : i64} {
  func.func @_activation_net_kernel(%arg0: i32, %arg1: memref<16x32xf32, #tpu.memory_space<vmem>>, %arg2: memref<32x64xf32, #tpu.memory_space<vmem>>, %arg3: memref<1x64xf32, #tpu.memory_space<vmem>>, %arg4: memref<64x32xf32, #tpu.memory_space<vmem>>, %arg5: memref<1x32xf32, #tpu.memory_space<vmem>>, %arg6: memref<8x32xf32, #tpu.memory_space<vmem>>, %arg7: memref<1x1xf32, #tpu.memory_space<vmem>>, %arg8: memref<1x16xf32, #tpu.memory_space<vmem>>, %arg9: memref<1x16xf32, #tpu.memory_space<vmem>>) attributes {dimension_semantics = [#tpu.dimension_semantics<parallel>], iteration_bounds = array<i64: 1>, scalar_prefetch = 0 : i64, scratch_operands = 0 : i64, tpu.core_type = #tpu.core_type<tc>, window_params = [{transform_indices = @transform_0, window_bounds = array<i64: 16, 32>}, {pipeline_mode = #tpu.pipeline_mode<synchronous>, transform_indices = @transform_1, window_bounds = array<i64: 32, 64>}, {pipeline_mode = #tpu.pipeline_mode<synchronous>, transform_indices = @transform_2, window_bounds = array<i64: 1, 64>}, {pipeline_mode = #tpu.pipeline_mode<synchronous>, transform_indices = @transform_3, window_bounds = array<i64: 64, 32>}, {pipeline_mode = #tpu.pipeline_mode<synchronous>, transform_indices = @transform_4, window_bounds = array<i64: 1, 32>}, {pipeline_mode = #tpu.pipeline_mode<synchronous>, transform_indices = @transform_5, window_bounds = array<i64: 8, 32>}, {pipeline_mode = #tpu.pipeline_mode<synchronous>, transform_indices = @transform_6, window_bounds = array<i64: 1, 1>}, {transform_indices = @transform_7, window_bounds = array<i64: 1, 16>}, {transform_indices = @transform_8, window_bounds = array<i64: 1, 16>}]} {
    %c0 = arith.constant 0 : index
    %c0_0 = arith.constant 0 : index
    %0 = vector.load %arg1[%c0, %c0_0] : memref<16x32xf32, #tpu.memory_space<vmem>>, vector<16x32xf32>
    %c0_1 = arith.constant 0 : index
    %c0_2 = arith.constant 0 : index
    %1 = vector.load %arg2[%c0_1, %c0_2] : memref<32x64xf32, #tpu.memory_space<vmem>>, vector<32x64xf32>
    %cst = arith.constant dense<0.000000e+00> : vector<16x64xf32>
    %2 = tpu.matmul %0, %1, %cst {dimension_numbers = #tpu.dot_dimension_numbers<[1], [0], [0], [1], [0, 0, 1, 1], [], []>} : vector<16x32xf32>, vector<32x64xf32>, vector<16x64xf32> -> vector<16x64xf32>
    %c0_3 = arith.constant 0 : index
    %c0_4 = arith.constant 0 : index
    %3 = vector.load %arg3[%c0_3, %c0_4] : memref<1x64xf32, #tpu.memory_space<vmem>>, vector<1x64xf32>
    %4 = vector.broadcast %3 : vector<1x64xf32> to vector<16x64xf32>
    %5 = arith.addf %2, %4 : vector<16x64xf32>
    %cst_5 = arith.constant 0.000000e+00 : f32
    %6 = vector.broadcast %cst_5 : f32 to vector<16x64xf32>
    %7 = arith.maximumf %5, %6 : vector<16x64xf32>
    %c0_6 = arith.constant 0 : index
    %c0_7 = arith.constant 0 : index
    %8 = vector.load %arg4[%c0_6, %c0_7] : memref<64x32xf32, #tpu.memory_space<vmem>>, vector<64x32xf32>
    %cst_8 = arith.constant dense<0.000000e+00> : vector<16x32xf32>
    %9 = tpu.matmul %7, %8, %cst_8 {dimension_numbers = #tpu.dot_dimension_numbers<[1], [0], [0], [1], [0, 0, 1, 1], [], []>} : vector<16x64xf32>, vector<64x32xf32>, vector<16x32xf32> -> vector<16x32xf32>
    %c0_9 = arith.constant 0 : index
    %c0_10 = arith.constant 0 : index
    %10 = vector.load %arg5[%c0_9, %c0_10] : memref<1x32xf32, #tpu.memory_space<vmem>>, vector<1x32xf32>
    %11 = vector.broadcast %10 : vector<1x32xf32> to vector<16x32xf32>
    %12 = arith.addf %9, %11 : vector<16x32xf32>
    %cst_11 = arith.constant 0.000000e+00 : f32
    %13 = vector.broadcast %cst_11 : f32 to vector<16x32xf32>
    %14 = arith.maximumf %12, %13 : vector<16x32xf32>
    %c0_12 = arith.constant 0 : index
    %c0_13 = arith.constant 0 : index
    %15 = vector.load %arg6[%c0_12, %c0_13] : memref<8x32xf32, #tpu.memory_space<vmem>>, vector<8x32xf32>
    %cst_14 = arith.constant dense<0.000000e+00> : vector<8x16xf32>
    %16 = tpu.matmul %15, %14, %cst_14 {dimension_numbers = #tpu.dot_dimension_numbers<[1], [1], [0], [0], [0, 0, 1, 0], [], []>} : vector<8x32xf32>, vector<16x32xf32>, vector<8x16xf32> -> vector<8x16xf32>
    %17 = vector.extract_strided_slice %16 {offsets = [0, 0], sizes = [1, 16], strides = [1, 1]} : vector<8x16xf32> to vector<1x16xf32>
    %c0_15 = arith.constant 0 : index
    %c0_16 = arith.constant 0 : index
    %18 = vector.load %arg7[%c0_15, %c0_16] : memref<1x1xf32, #tpu.memory_space<vmem>>, vector<1x1xf32>
    %19 = vector.broadcast %18 : vector<1x1xf32> to vector<1x16xf32>
    %20 = arith.addf %17, %19 : vector<1x16xf32>
    %21 = arith.negf %20 : vector<1x16xf32>
    %22 = math.exp %21 : vector<1x16xf32>
    %cst_17 = arith.constant 1.000000e+00 : f32
    %23 = vector.broadcast %cst_17 : f32 to vector<1x16xf32>
    %24 = arith.addf %23, %22 : vector<1x16xf32>
    %25 = arith.divf %23, %24 : vector<1x16xf32>
    %c0_18 = arith.constant 0 : index
    %c0_19 = arith.constant 0 : index
    %26 = vector.load %arg8[%c0_18, %c0_19] : memref<1x16xf32, #tpu.memory_space<vmem>>, vector<1x16xf32>
    %27 = arith.mulf %25, %26 : vector<1x16xf32>
    %c0_20 = arith.constant 0 : index
    %c0_21 = arith.constant 0 : index
    %28 = vector.load %arg9[%c0_20, %c0_21] : memref<1x16xf32, #tpu.memory_space<vmem>>, vector<1x16xf32>
    tpu.vector_store %arg9[%c0_20, %c0_21], %27 {strides = array<i32>} : memref<1x16xf32, #tpu.memory_space<vmem>>, vector<1x16xf32>,
    return
  }
  func.func @transform_0(%arg0: i32) -> (i32, i32) {
    %c0_i32 = arith.constant 0 : i32
    %c0_i32_0 = arith.constant 0 : i32
    return %arg0, %c0_i32 : i32, i32
  }
  func.func @transform_1(%arg0: i32) -> (i32, i32) {
    %c0_i32 = arith.constant 0 : i32
    %c0_i32_0 = arith.constant 0 : i32
    %c0_i32_1 = arith.constant 0 : i32
    return %c0_i32, %c0_i32_0 : i32, i32
  }
  func.func @transform_2(%arg0: i32) -> (i32, i32) {
    %c0_i32 = arith.constant 0 : i32
    %c0_i32_0 = arith.constant 0 : i32
    %c0_i32_1 = arith.constant 0 : i32
    return %c0_i32, %c0_i32_0 : i32, i32
  }
  func.func @transform_3(%arg0: i32) -> (i32, i32) {
    %c0_i32 = arith.constant 0 : i32
    %c0_i32_0 = arith.constant 0 : i32
    %c0_i32_1 = arith.constant 0 : i32
    return %c0_i32, %c0_i32_0 : i32, i32
  }
  func.func @transform_4(%arg0: i32) -> (i32, i32) {
    %c0_i32 = arith.constant 0 : i32
    %c0_i32_0 = arith.constant 0 : i32
    %c0_i32_1 = arith.constant 0 : i32
    return %c0_i32, %c0_i32_0 : i32, i32
  }
  func.func @transform_5(%arg0: i32) -> (i32, i32) {
    %c0_i32 = arith.constant 0 : i32
    %c0_i32_0 = arith.constant 0 : i32
    %c0_i32_1 = arith.constant 0 : i32
    return %c0_i32, %c0_i32_0 : i32, i32
  }
  func.func @transform_6(%arg0: i32) -> (i32, i32) {
    %c0_i32 = arith.constant 0 : i32
    %c0_i32_0 = arith.constant 0 : i32
    %c0_i32_1 = arith.constant 0 : i32
    return %c0_i32, %c0_i32_0 : i32, i32
  }
  func.func @transform_7(%arg0: i32) -> (i32, i32) {
    %c0_i32 = arith.constant 0 : i32
    %c0_i32_0 = arith.constant 0 : i32
    return %c0_i32, %arg0 : i32, i32
  }
  func.func @transform_8(%arg0: i32) -> (i32, i32) {
    %c0_i32 = arith.constant 0 : i32
    %c0_i32_0 = arith.constant 0 : i32
    return %c0_i32, %arg0 : i32, i32
  }
}

module attributes {stable_mosaic.version = 11 : i64} {
  func.func @_activation_net_kernel(%arg0: i32, %arg1: memref<16x32xf32, #tpu.memory_space<vmem>>, %arg2: memref<32x64xf32, #tpu.memory_space<vmem>>, %arg3: memref<1x64xf32, #tpu.memory_space<vmem>>, %arg4: memref<64x32xf32, #tpu.memory_space<vmem>>, %arg5: memref<1x32xf32, #tpu.memory_space<vmem>>, %arg6: memref<8x32xf32, #tpu.memory_space<vmem>>, %arg7: memref<1x1xf32, #tpu.memory_space<vmem>>, %arg8: memref<1x16xf32, #tpu.memory_space<vmem>>, %arg9: memref<1x16xf32, #tpu.memory_space<vmem>>) attributes {dimension_semantics = [#tpu.dimension_semantics<parallel>], iteration_bounds = array<i64: 1>, scalar_prefetch = 0 : i64, scratch_operands = 0 : i64, tpu.core_type = #tpu.core_type<tc>, window_params = [{transform_indices = @transform_0, window_bounds = array<i64: 16, 32>}, {pipeline_mode = #tpu.pipeline_mode<synchronous>, transform_indices = @transform_1, window_bounds = array<i64: 32, 64>}, {pipeline_mode = #tpu.pipeline_mode<synchronous>, transform_indices = @transform_2, window_bounds = array<i64: 1, 64>}, {pipeline_mode = #tpu.pipeline_mode<synchronous>, transform_indices = @transform_3, window_bounds = array<i64: 64, 32>}, {pipeline_mode = #tpu.pipeline_mode<synchronous>, transform_indices = @transform_4, window_bounds = array<i64: 1, 32>}, {pipeline_mode = #tpu.pipeline_mode<synchronous>, transform_indices = @transform_5, window_bounds = array<i64: 8, 32>}, {pipeline_mode = #tpu.pipeline_mode<synchronous>, transform_indices = @transform_6, window_bounds = array<i64: 1, 1>}, {transform_indices = @transform_7, window_bounds = array<i64: 1, 16>}, {transform_indices = @transform_8, window_bounds = array<i64: 1, 16>}]} {
    %c0 = arith.constant 0 : index
    %c0_0 = arith.constant 0 : index
    %0 = vector.load %arg1[%c0, %c0_0] : memref<16x32xf32, #tpu.memory_space<vmem>>, vector<16x32xf32>
    %c0_1 = arith.constant 0 : index
    %c0_2 = arith.constant 0 : index
    %1 = vector.load %arg2[%c0_1, %c0_2] : memref<32x64xf32, #tpu.memory_space<vmem>>, vector<32x64xf32>
    %cst = arith.constant dense<0.000000e+00> : vector<16x64xf32>
    %2 = tpu.matmul %0, %1, %cst {dimension_numbers = #tpu.dot_dimension_numbers<[1], [0], [0], [1], [0, 0, 1, 1], [], []>} : vector<16x32xf32>, vector<32x64xf32>, vector<16x64xf32> -> vector<16x64xf32>
    %c0_3 = arith.constant 0 : index
    %c0_4 = arith.constant 0 : index
    %3 = vector.load %arg3[%c0_3, %c0_4] : memref<1x64xf32, #tpu.memory_space<vmem>>, vector<1x64xf32>
    %4 = vector.broadcast %3 : vector<1x64xf32> to vector<16x64xf32>
    %5 = arith.addf %2, %4 : vector<16x64xf32>
    %cst_5 = arith.constant 0.000000e+00 : f32
    %6 = vector.broadcast %cst_5 : f32 to vector<16x64xf32>
    %7 = arith.maximumf %5, %6 : vector<16x64xf32>
    %c0_6 = arith.constant 0 : index
    %c0_7 = arith.constant 0 : index
    %8 = vector.load %arg4[%c0_6, %c0_7] : memref<64x32xf32, #tpu.memory_space<vmem>>, vector<64x32xf32>
    %cst_8 = arith.constant dense<0.000000e+00> : vector<16x32xf32>
    %9 = tpu.matmul %7, %8, %cst_8 {dimension_numbers = #tpu.dot_dimension_numbers<[1], [0], [0], [1], [0, 0, 1, 1], [], []>} : vector<16x64xf32>, vector<64x32xf32>, vector<16x32xf32> -> vector<16x32xf32>
    %c0_9 = arith.constant 0 : index
    %c0_10 = arith.constant 0 : index
    %10 = vector.load %arg5[%c0_9, %c0_10] : memref<1x32xf32, #tpu.memory_space<vmem>>, vector<1x32xf32>
    %11 = vector.broadcast %10 : vector<1x32xf32> to vector<16x32xf32>
    %12 = arith.addf %9, %11 : vector<16x32xf32>
    %cst_11 = arith.constant 0.000000e+00 : f32
    %13 = vector.broadcast %cst_11 : f32 to vector<16x32xf32>
    %14 = arith.maximumf %12, %13 : vector<16x32xf32>
    %c0_12 = arith.constant 0 : index
    %c0_13 = arith.constant 0 : index
    %15 = vector.load %arg6[%c0_12, %c0_13] : memref<8x32xf32, #tpu.memory_space<vmem>>, vector<8x32xf32>
    %cst_14 = arith.constant dense<0.000000e+00> : vector<8x16xf32>
    %16 = tpu.matmul %15, %14, %cst_14 {dimension_numbers = #tpu.dot_dimension_numbers<[1], [1], [0], [0], [0, 0, 1, 0], [], []>} : vector<8x32xf32>, vector<16x32xf32>, vector<8x16xf32> -> vector<8x16xf32>
    %17 = vector.extract_strided_slice %16 {offsets = [0, 0], sizes = [1, 16], strides = [1, 1]} : vector<8x16xf32> to vector<1x16xf32>
    %c0_15 = arith.constant 0 : index
    %c0_16 = arith.constant 0 : index
    %18 = vector.load %arg7[%c0_15, %c0_16] : memref<1x1xf32, #tpu.memory_space<vmem>>, vector<1x1xf32>
    %19 = vector.broadcast %18 : vector<1x1xf32> to vector<1x16xf32>
    %20 = arith.addf %17, %19 : vector<1x16xf32>
    %21 = arith.negf %20 : vector<1x16xf32>
    %22 = math.exp %21 : vector<1x16xf32>
    %cst_17 = arith.constant 1.000000e+00 : f32
    %23 = vector.broadcast %cst_17 : f32 to vector<1x16xf32>
    %24 = arith.addf %23, %22 : vector<1x16xf32>
    %25 = arith.divf %23, %24 : vector<1x16xf32>
    %c0_18 = arith.constant 0 : index
    %c0_19 = arith.constant 0 : index
    %26 = vector.load %arg8[%c0_18, %c0_19] : memref<1x16xf32, #tpu.memory_space<vmem>>, vector<1x16xf32>
    %27 = arith.mulf %25, %26 : vector<1x16xf32>
    %c0_20 = arith.constant 0 : index
    %c0_21 = arith.constant 0 : index
    %28 = vector.load %arg9[%c0_20, %c0_21] : memref<1x16xf32, #tpu.memory_space<vmem>>, vector<1x16xf32>
    tpu.vector_store %arg9[%c0_20, %c0_21], %27 {strides = array<i32>} : memref<1x16xf32, #tpu.memory_space<vmem>>, vector<1x16xf32>,
    return
  }
  func.func @transform_0(%arg0: i32) -> (i32, i32) {
    %c0_i32 = arith.constant 0 : i32
    %c0_i32_0 = arith.constant 0 : i32
    return %arg0, %c0_i32 : i32, i32
  }
  func.func @transform_1(%arg0: i32) -> (i32, i32) {
    %c0_i32 = arith.constant 0 : i32
    %c0_i32_0 = arith.constant 0 : i32
    %c0_i32_1 = arith.constant 0 : i32
    return %c0_i32, %c0_i32_0 : i32, i32
  }
  func.func @transform_2(%arg0: i32) -> (i32, i32) {
    %c0_i32 = arith.constant 0 : i32
    %c0_i32_0 = arith.constant 0 : i32
    %c0_i32_1 = arith.constant 0 : i32
    return %c0_i32, %c0_i32_0 : i32, i32
  }
  func.func @transform_3(%arg0: i32) -> (i32, i32) {
    %c0_i32 = arith.constant 0 : i32
    %c0_i32_0 = arith.constant 0 : i32
    %c0_i32_1 = arith.constant 0 : i32
    return %c0_i32, %c0_i32_0 : i32, i32
  }
  func.func @transform_4(%arg0: i32) -> (i32, i32) {
    %c0_i32 = arith.constant 0 : i32
    %c0_i32_0 = arith.constant 0 : i32
    %c0_i32_1 = arith.constant 0 : i32
    return %c0_i32, %c0_i32_0 : i32, i32
  }
  func.func @transform_5(%arg0: i32) -> (i32, i32) {
    %c0_i32 = arith.constant 0 : i32
    %c0_i32_0 = arith.constant 0 : i32
    %c0_i32_1 = arith.constant 0 : i32
    return %c0_i32, %c0_i32_0 : i32, i32
  }
  func.func @transform_6(%arg0: i32) -> (i32, i32) {
    %c0_i32 = arith.constant 0 : i32
    %c0_i32_0 = arith.constant 0 : i32
    %c0_i32_1 = arith.constant 0 : i32
    return %c0_i32, %c0_i32_0 : i32, i32
  }
  func.func @transform_7(%arg0: i32) -> (i32, i32) {
    %c0_i32 = arith.constant 0 : i32
    %c0_i32_0 = arith.constant 0 : i32
    return %c0_i32, %arg0 : i32, i32
  }
  func.func @transform_8(%arg0: i32) -> (i32, i32) {
    %c0_i32 = arith.constant 0 : i32
    %c0_i32_0 = arith.constant 0 : i32
    return %c0_i32, %arg0 : i32, i32
  }
}

</mosaic_0001>

<bundles_post_ra>
// kernel: tpu_custom_call.1
= control target key start
LH: loop header
LB: loop body
LE: loop exit
PB: predicated region body
PF: predicated region fallthrough
CT: control target
= control target key end

     0   :  { %s595_s0 = inlined_call_operand.vmem [shape: f32[16,32], index: 0, kind: input, shape index: {}]   ;;  %s596_s1 = inlined_call_operand.vmem [shape: f32[32,64], index: 1, kind: input, shape index: {}]   ;;  %s597_s2 = inlined_call_operand.vmem [shape: f32[1,64], index: 2, kind: input, shape index: {}]   ;;  %s598_s3 = inlined_call_operand.vmem [shape: f32[64,32], index: 3, kind: input, shape index: {}]   ;;  %s599_s4 = inlined_call_operand.vmem [shape: f32[1,32], index: 4, kind: input, shape index: {}]   ;;  %s600_s5 = inlined_call_operand.vmem [shape: f32[8,32], index: 5, kind: input, shape index: {}]   ;;  %s601_s6 = inlined_call_operand.<no memory space> [shape: f32[1,1], index: 6, kind: input, shape index: {}]   ;;  %s602_s7 = inlined_call_operand.vmem [shape: f32[1,16], index: 7, kind: input, shape index: {}]   ;;  %s603_s8 = inlined_call_operand.hbm [shape: f32[1,16], index: 8, kind: output, shape index: {}]  }
   0x1   :  { %v13_v0 = vstv %s601_s6 }
   0x2   :  { %14 = vst [vmem:[#allocation2] sm:$0x1] %v13_v0 }
   0x3   :  { %v34_v1 = vld [vmem:[%s596_s1] sm:$0xff]  ;;  %v35_v2 = vld [vmem:[%s596_s1 + $0x8] sm:$0xff]  ;;  %v36_v3 = vld [vmem:[%s596_s1 + $0x10] sm:$0xff]  ;;  %vm45_vm0 = vcmask 261120  }
   0x4   :  { %v409_v4 = vpack.c.bf16 %v35_v2, %v34_v1  ;;  %v37_v5 = vld [vmem:[%s596_s1 + $0x18] sm:$0xff]  ;;  %v32_v6 = vld [vmem:[%s595_s0] sm:$0xff]  ;;  %v130_v9 = vld [vmem:[%s598_s3 + $0x8] sm:$0xff] }
   0x5   :  { %v413_v7 = vpack.c.bf16 %v37_v5, %v36_v3  ;;  %380 = vmatprep.mubr.msk.f32.mxu0 %vm45_vm0, %v32_v6  ;;  %v129_v8 = vld [vmem:[%s598_s3] sm:$0xff]  ;;  %v131_v10 = vld [vmem:[%s598_s3 + $0x10] sm:$0xff]  ;;  %v132_v12 = vld [vmem:[%s598_s3 + $0x18] sm:$0xff] }
   0x6   :  { %410 = vmatprep.subr.bf16.mxu0 %v409_v4  ;;  %v417_v11 = vpack.c.bf16 %v130_v9, %v129_v8  ;;  %v421_v13 = vpack.c.bf16 %v132_v12, %v131_v10  ;;  %v133_v14 = vld [vmem:[%s598_s3 + $0x20] sm:$0xff]  ;;  %v134_v15 = vld [vmem:[%s598_s3 + $0x28] sm:$0xff] }
   0x7   :  { %412 = vmatpush3.bf16.msra.mxu0 %v409_v4 }
   0x8   :  { %15 = vsyncpa [#allocation4], 0  ;;  %414 = vmatprep.subr.bf16.mxu0 %v413_v7  ;;  %418 = vmatprep.subr.bf16.mxu1 %v417_v11  ;;  %v425_v16 = vpack.c.bf16 %v134_v15, %v133_v14  ;;  %v33_v17 = vld [vmem:[%s595_s0 + $0x8] sm:$0xff]  ;;  %v135_v18 = vld [vmem:[%s598_s3 + $0x30] sm:$0xff]  ;;  %vm144_vm1 = vcmask 523264   ;;  %v471_v28 = vmov 0.0|0.0   ;;  %v314_v41 = vlaneseq }
   0x9   :  { %420 = vmatpush3.bf16.msra.mxu1 %v417_v11  ;;  %v136_v19 = vld [vmem:[%s598_s3 + $0x38] sm:$0xff]  ;;  %v343_v21 = vld [vmem:[%s597_s2] ss:$0 sm:$0xff]  ;;  %vm472_vm2 = vmmov 0   ;;  %v473_v29 = vmov 0.0   ;;  %v474_v31 = vmov 0   ;;  %vm435_vm3 = vmpackc.low %vm45_vm0, %vm45_vm0 }
   0xa   :  { %422 = vmatprep.subr.bf16.mxu1 %v421_v13  ;;  %v429_v20 = vpack.c.bf16 %v136_v19, %v135_v18  ;;  %v308_v30 = vld [vmem:[#allocation2] sm:$0x1]  ;;  %442 = vset.pattern.permute.xlu0 %v474_v31  ;;  %v315_v42 = vshrl.u32 %v314_v41, 7  ;;  %vm327_vm4 = vcmask 122880  }
   0xb   :  { %416 = vmatpush3.bf16.msra.mxu0 %v413_v7  ;;  %311 = vperm.xlu0 %442, %v308_v30   ;;  %v346_v32 = vld [vmem:[%s599_s4] ss:$0 sm:$0xff] }
   0xc   :  { %433 = vmatprep.subr.bf16.mxu0 %v471_v28  ;;  %v228_v40 = vld [vmem:[%s600_s5] sm:$0xff]  ;;  %v316_v43 = vsub.s32 0, %v315_v42  ;;  %s475_s5 = smov [#allocation3]  }
   0xd   :  { %424 = vmatpush3.bf16.msra.mxu1 %v421_v13  ;;  %v325_v52 = vld [vmem:[%s602_s7] sm:$0x1]  ;;  %s335_s6 = sshll.u32 %s475_s5, 4  ;;  %s336_s6 = int_to_ptr.vmem [resolvable:$true] %s335_s6 }
   0xe   :  { %381 = vmatmul.mubr.msk.f32.vlgmr.msra.gmra.mrb[0].mxu0 %vm45_vm0, %v33_v17  ;;  %426 = vmatprep.subr.bf16.mxu1 %v425_v16  ;;  %s447_s15 = scalar_lea.vmem %s336_s6, 16  ;;  %s451_s16 = scalar_lea.vmem %s336_s6, 32 }
   0xf   :  { %406 = vmatprep.mubr.msk.f32.mxu0 %vm472_vm2, %v473_v29  ;;  %p448_p0 = scmp.ne.s32.totalorder %s336_s6, %s447_s15  ;;  %p452_p1 = scmp.lt.s32.totalorder %s336_s6, %s336_s6 }
  0x10   :  { %p453_p2 = scmp.lt.s32.totalorder %s451_s16, %s447_s15 }
  0x11   :  { %428 = vmatpush3.bf16.msra.mxu1 %v425_v16 }
  0x12   :  { %430 = vmatprep.subr.bf16.mxu1 %v429_v20  ;;  %p454_p3 = por %p453_p2, %p452_p1 }
  0x14   :  { %p455_p4 = pnand %p454_p3, %p448_p0 }
  0x15   :  { %432 = vmatpush3.bf16.msra.mxu1 %v429_v20 }
  0x8a   :  { %v312_v44 = vpop.permute.xlu0 %311 }
  0x8b   :  { %v317_v45 = vrot.slane %v312_v44, %v316_v43 }
  0xe1   :  { %v382_v22 = vpop.f32.mrb[0].mxu0 }
  0xe2   :  { %v124_v23 = vadd.f32 %v382_v22, %v343_v21  ;;  %v118_v24 = vpop.f32.mrb[1].mxu0 }
  0xe3   :  { %v119_v25 = vadd.f32 %v343_v21, %v118_v24 }
  0xe4   :  { %v128_v27 = vmax.f32 %v124_v23, 0.0 }
  0xe5   :  { %v127_v26 = vmax.f32 %v119_v25, 0.0 }
  0xe7   :  { %399 = vmatprep.mubr.msk.f32.mxu1 %vm144_vm1, %v127_v26 }
  0xe8   :  { %400 = vmatmul.mubr.msk.f32.vlgmr.msra.gmra.mrb[0].mxu1 %vm144_vm1, %v128_v27 }
 0x1bb   :  { %v401_v33 = vpop.f32.mrb[0].mxu1 }
 0x1bc   :  { %v223_v34 = vadd.f32 %v401_v33, %v346_v32  ;;  %v217_v35 = vpop.f32.mrb[1].mxu1 }
 0x1bd   :  { %v218_v36 = vadd.f32 %v346_v32, %v217_v35 }
 0x1be   :  { %v227_v37 = vmax.f32 %v223_v34, 0.0 }
 0x1bf   :  { %v226_v38 = vmax.f32 %v218_v36, 0.0 }
 0x1c1   :  { %v434_v39 = vpack.c.bf16 %v227_v37, %v226_v38 }
 0x1c3   :  { %436 = vmatpush3.bf16.xpose.msk.msra.mxu0 %vm435_vm3, %v434_v39 }
 0x1ca   :  { %407 = vmatmul.mubr.msk.f32.vlgmr.msra.gmra.mrb[2].mxu0 %vm45_vm0, %v228_v40 }
 0x29d   :  { %v304_v46 = vpop.f32.mrb[2].mxu0 }
 0x29e   :  { %v318_v47 = vadd.f32 %v317_v45, %v304_v46  ;;  %v408_v48 = vpop.f32.mrb[3].mxu0 }
 0x2a0   :  { %v352_v49 = vmul.f32 -1.442695, %v318_v47 }
 0x2a2   :  { %443 = vpow2.f32 %v352_v49 }
 0x2ac   :  { %v444_v50 = vpop.eup %443 }
 0x2ad   :  { %v322_v51 = vadd.f32 1.0, %v444_v50 }
 0x2af   :  { %445 = vrcp.f32 %v322_v51 }
 0x2b9   :  { %v446_v53 = vpop.eup %445 }
 0x2ba   :  { %v326_v54 = vmul.f32 %v446_v53, %v325_v52 }
 0x2bc   :  { %328 = vst.msk [vmem:[#allocation3] sm:$0x1] %vm327_vm4, %v326_v54 }
 0x2bd   :  { %458 = shalt.err (!%p455_p4)
}
 0x2be   :  { %s459_s19 = scalar_lea.hbm %s603_s8, 16 }
 0x2bf   :  { %p460_p5 = scmp.ne.s32.totalorder %s603_s8, %s459_s19  ;;  %p463_p6 = scmp.lt.u32.totalorder %s459_s19, %s603_s8 }
 0x2c1   :  { %p465_p7 = pnand %p463_p6, %p460_p5 }
 0x2c3   :  { %468 = shalt.err (!%p465_p7)
}
 0x2c4   :  { %338 = dma.vmem_to_hbm [thread:$0]  %s336_s6, 16, %s603_s8, [#allocation4]  }
 0x2c5   :  { %469 = dma.done.wait [#allocation4], 16  }
 0x2c6   :  { %470 = vsyncadd [#allocation4], 4294967280 }
 0x2c7   :  { %342 = vsyncpa [#allocation4], 1 }

// kernel: tpu_custom_call.1
= control target key start
LH: loop header
LB: loop body
LE: loop exit
PB: predicated region body
PF: predicated region fallthrough
CT: control target
= control target key end

     0   :  { %s595_s0 = inlined_call_operand.vmem [shape: f32[16,32], index: 0, kind: input, shape index: {}]   ;;  %s596_s1 = inlined_call_operand.vmem [shape: f32[32,64], index: 1, kind: input, shape index: {}]   ;;  %s597_s2 = inlined_call_operand.vmem [shape: f32[1,64], index: 2, kind: input, shape index: {}]   ;;  %s598_s3 = inlined_call_operand.vmem [shape: f32[64,32], index: 3, kind: input, shape index: {}]   ;;  %s599_s4 = inlined_call_operand.vmem [shape: f32[1,32], index: 4, kind: input, shape index: {}]   ;;  %s600_s5 = inlined_call_operand.vmem [shape: f32[8,32], index: 5, kind: input, shape index: {}]   ;;  %s601_s6 = inlined_call_operand.<no memory space> [shape: f32[1,1], index: 6, kind: input, shape index: {}]   ;;  %s602_s7 = inlined_call_operand.vmem [shape: f32[1,16], index: 7, kind: input, shape index: {}]   ;;  %s603_s8 = inlined_call_operand.hbm [shape: f32[1,16], index: 8, kind: output, shape index: {}]  }
   0x1   :  { %v13_v0 = vstv %s601_s6 }
   0x2   :  { %14 = vst [vmem:[#allocation2] sm:$0x1] %v13_v0 }
   0x3   :  { %v34_v1 = vld [vmem:[%s596_s1] sm:$0xff]  ;;  %v35_v2 = vld [vmem:[%s596_s1 + $0x8] sm:$0xff]  ;;  %v36_v3 = vld [vmem:[%s596_s1 + $0x10] sm:$0xff]  ;;  %vm45_vm0 = vcmask 261120  }
   0x4   :  { %v409_v4 = vpack.c.bf16 %v35_v2, %v34_v1  ;;  %v37_v5 = vld [vmem:[%s596_s1 + $0x18] sm:$0xff]  ;;  %v32_v6 = vld [vmem:[%s595_s0] sm:$0xff]  ;;  %v130_v9 = vld [vmem:[%s598_s3 + $0x8] sm:$0xff] }
   0x5   :  { %v413_v7 = vpack.c.bf16 %v37_v5, %v36_v3  ;;  %380 = vmatprep.mubr.msk.f32.mxu0 %vm45_vm0, %v32_v6  ;;  %v129_v8 = vld [vmem:[%s598_s3] sm:$0xff]  ;;  %v131_v10 = vld [vmem:[%s598_s3 + $0x10] sm:$0xff]  ;;  %v132_v12 = vld [vmem:[%s598_s3 + $0x18] sm:$0xff] }
   0x6   :  { %410 = vmatprep.subr.bf16.mxu0 %v409_v4  ;;  %v417_v11 = vpack.c.bf16 %v130_v9, %v129_v8  ;;  %v421_v13 = vpack.c.bf16 %v132_v12, %v131_v10  ;;  %v133_v14 = vld [vmem:[%s598_s3 + $0x20] sm:$0xff]  ;;  %v134_v15 = vld [vmem:[%s598_s3 + $0x28] sm:$0xff] }
   0x7   :  { %412 = vmatpush3.bf16.msra.mxu0 %v409_v4 }
   0x8   :  { %15 = vsyncpa [#allocation4], 0  ;;  %414 = vmatprep.subr.bf16.mxu0 %v413_v7  ;;  %418 = vmatprep.subr.bf16.mxu1 %v417_v11  ;;  %v425_v16 = vpack.c.bf16 %v134_v15, %v133_v14  ;;  %v33_v17 = vld [vmem:[%s595_s0 + $0x8] sm:$0xff]  ;;  %v135_v18 = vld [vmem:[%s598_s3 + $0x30] sm:$0xff]  ;;  %vm144_vm1 = vcmask 523264   ;;  %v471_v28 = vmov 0.0|0.0   ;;  %v314_v41 = vlaneseq }
   0x9   :  { %420 = vmatpush3.bf16.msra.mxu1 %v417_v11  ;;  %v136_v19 = vld [vmem:[%s598_s3 + $0x38] sm:$0xff]  ;;  %v343_v21 = vld [vmem:[%s597_s2] ss:$0 sm:$0xff]  ;;  %vm472_vm2 = vmmov 0   ;;  %v473_v29 = vmov 0.0   ;;  %v474_v31 = vmov 0   ;;  %vm435_vm3 = vmpackc.low %vm45_vm0, %vm45_vm0 }
   0xa   :  { %422 = vmatprep.subr.bf16.mxu1 %v421_v13  ;;  %v429_v20 = vpack.c.bf16 %v136_v19, %v135_v18  ;;  %v308_v30 = vld [vmem:[#allocation2] sm:$0x1]  ;;  %442 = vset.pattern.permute.xlu0 %v474_v31  ;;  %v315_v42 = vshrl.u32 %v314_v41, 7  ;;  %vm327_vm4 = vcmask 122880  }
   0xb   :  { %416 = vmatpush3.bf16.msra.mxu0 %v413_v7  ;;  %311 = vperm.xlu0 %442, %v308_v30   ;;  %v346_v32 = vld [vmem:[%s599_s4] ss:$0 sm:$0xff] }
   0xc   :  { %433 = vmatprep.subr.bf16.mxu0 %v471_v28  ;;  %v228_v40 = vld [vmem:[%s600_s5] sm:$0xff]  ;;  %v316_v43 = vsub.s32 0, %v315_v42  ;;  %s475_s5 = smov [#allocation3]  }
   0xd   :  { %424 = vmatpush3.bf16.msra.mxu1 %v421_v13  ;;  %v325_v52 = vld [vmem:[%s602_s7] sm:$0x1]  ;;  %s335_s6 = sshll.u32 %s475_s5, 4  ;;  %s336_s6 = int_to_ptr.vmem [resolvable:$true] %s335_s6 }
   0xe   :  { %381 = vmatmul.mubr.msk.f32.vlgmr.msra.gmra.mrb[0].mxu0 %vm45_vm0, %v33_v17  ;;  %426 = vmatprep.subr.bf16.mxu1 %v425_v16  ;;  %s447_s15 = scalar_lea.vmem %s336_s6, 16  ;;  %s451_s16 = scalar_lea.vmem %s336_s6, 32 }
   0xf   :  { %406 = vmatprep.mubr.msk.f32.mxu0 %vm472_vm2, %v473_v29  ;;  %p448_p0 = scmp.ne.s32.totalorder %s336_s6, %s447_s15  ;;  %p452_p1 = scmp.lt.s32.totalorder %s336_s6, %s336_s6 }
  0x10   :  { %p453_p2 = scmp.lt.s32.totalorder %s451_s16, %s447_s15 }
  0x11   :  { %428 = vmatpush3.bf16.msra.mxu1 %v425_v16 }
  0x12   :  { %430 = vmatprep.subr.bf16.mxu1 %v429_v20  ;;  %p454_p3 = por %p453_p2, %p452_p1 }
  0x14   :  { %p455_p4 = pnand %p454_p3, %p448_p0 }
  0x15   :  { %432 = vmatpush3.bf16.msra.mxu1 %v429_v20 }
  0x8a   :  { %v312_v44 = vpop.permute.xlu0 %311 }
  0x8b   :  { %v317_v45 = vrot.slane %v312_v44, %v316_v43 }
  0xe1   :  { %v382_v22 = vpop.f32.mrb[0].mxu0 }
  0xe2   :  { %v124_v23 = vadd.f32 %v382_v22, %v343_v21  ;;  %v118_v24 = vpop.f32.mrb[1].mxu0 }
  0xe3   :  { %v119_v25 = vadd.f32 %v343_v21, %v118_v24 }
  0xe4   :  { %v128_v27 = vmax.f32 %v124_v23, 0.0 }
  0xe5   :  { %v127_v26 = vmax.f32 %v119_v25, 0.0 }
  0xe7   :  { %399 = vmatprep.mubr.msk.f32.mxu1 %vm144_vm1, %v127_v26 }
  0xe8   :  { %400 = vmatmul.mubr.msk.f32.vlgmr.msra.gmra.mrb[0].mxu1 %vm144_vm1, %v128_v27 }
 0x1bb   :  { %v401_v33 = vpop.f32.mrb[0].mxu1 }
 0x1bc   :  { %v223_v34 = vadd.f32 %v401_v33, %v346_v32  ;;  %v217_v35 = vpop.f32.mrb[1].mxu1 }
 0x1bd   :  { %v218_v36 = vadd.f32 %v346_v32, %v217_v35 }
 0x1be   :  { %v227_v37 = vmax.f32 %v223_v34, 0.0 }
 0x1bf   :  { %v226_v38 = vmax.f32 %v218_v36, 0.0 }
 0x1c1   :  { %v434_v39 = vpack.c.bf16 %v227_v37, %v226_v38 }
 0x1c3   :  { %436 = vmatpush3.bf16.xpose.msk.msra.mxu0 %vm435_vm3, %v434_v39 }
 0x1ca   :  { %407 = vmatmul.mubr.msk.f32.vlgmr.msra.gmra.mrb[2].mxu0 %vm45_vm0, %v228_v40 }
 0x29d   :  { %v304_v46 = vpop.f32.mrb[2].mxu0 }
 0x29e   :  { %v318_v47 = vadd.f32 %v317_v45, %v304_v46  ;;  %v408_v48 = vpop.f32.mrb[3].mxu0 }
 0x2a0   :  { %v352_v49 = vmul.f32 -1.442695, %v318_v47 }
 0x2a2   :  { %443 = vpow2.f32 %v352_v49 }
 0x2ac   :  { %v444_v50 = vpop.eup %443 }
 0x2ad   :  { %v322_v51 = vadd.f32 1.0, %v444_v50 }
 0x2af   :  { %445 = vrcp.f32 %v322_v51 }
 0x2b9   :  { %v446_v53 = vpop.eup %445 }
 0x2ba   :  { %v326_v54 = vmul.f32 %v446_v53, %v325_v52 }
 0x2bc   :  { %328 = vst.msk [vmem:[#allocation3] sm:$0x1] %vm327_vm4, %v326_v54 }
 0x2bd   :  { %458 = shalt.err (!%p455_p4)
}
 0x2be   :  { %s459_s19 = scalar_lea.hbm %s603_s8, 16 }
 0x2bf   :  { %p460_p5 = scmp.ne.s32.totalorder %s603_s8, %s459_s19  ;;  %p463_p6 = scmp.lt.u32.totalorder %s459_s19, %s603_s8 }
 0x2c1   :  { %p465_p7 = pnand %p463_p6, %p460_p5 }
 0x2c3   :  { %468 = shalt.err (!%p465_p7)
}
 0x2c4   :  { %338 = dma.vmem_to_hbm [thread:$0]  %s336_s6, 16, %s603_s8, [#allocation4]  }
 0x2c5   :  { %469 = dma.done.wait [#allocation4], 16  }
 0x2c6   :  { %470 = vsyncadd [#allocation4], 4294967280 }
 0x2c7   :  { %342 = vsyncpa [#allocation4], 1 }

</bundles_post_ra>
